<compile_context>
chip_gen: v7x
topology: tpu7x:2x2x1
jax: 0.10.0
libtpu: 0.0.40
codegen_flags: <defaults>
</compile_context>

<pallas_src>
import jax
import jax.numpy as jnp
from jax.experimental import pallas as pl
from jax.experimental.pallas import tpu as pltpu

HP = 128  # hidden dim padded to one full lane width


def _reward_net_kernel(x_ref, w1_ref, b1_ref, w2_ref, b2_ref, o_ref):
    # x_ref:  (TB, F)     w1_ref: (F, HP)   b1_ref: (1, HP)
    # w2_ref: (1, HP)     b2_ref: (1, 1)    o_ref:  (TB, 1)
    x = x_ref[...]
    # fc1 on the MXU (f32 accumulate), bias + ReLU on the VPU (lane-dense).
    h = jnp.dot(x, w1_ref[...], preferred_element_type=jnp.float32)
    h = jnp.maximum(h + b1_ref[...], 0.0)
    # fc2 as VPU multiply + cross-lane (XLU) reduction; avoids a 1-wide MXU pass.
    y = jnp.sum(h * w2_ref[...], axis=-1, keepdims=True) + b2_ref[...]
    o_ref[...] = y.astype(o_ref.dtype)


def _pick_batch_tile(batch, feat_dim, target_bytes=1 << 20):
    """Batch tile: ~1 MiB x-block, multiple of 8, capped at 8192 / padded B."""
    tb = (target_bytes // (feat_dim * 4)) // 8 * 8
    tb = max(8, min(8192, tb))
    b8 = ((batch + 7) // 8) * 8
    return min(tb, b8)


def reward_net_forward(x, w1, b1, w2, b2):
    """x: (B, F) f32.  w1: (F, 10), b1: (10,), w2: (10, 1), b2: (1,)."""
    B, F = x.shape
    H = w1.shape[1]

    # Zero-pad hidden dim to HP=128 (padded units contribute exactly 0).
    w1_p = jnp.zeros((F, HP), x.dtype).at[:, :H].set(w1)
    b1_p = jnp.zeros((1, HP), x.dtype).at[0, :H].set(b1)
    w2_row = jnp.zeros((1, HP), x.dtype).at[0, :H].set(w2[:, 0])
    b2_2d = b2.reshape(1, 1).astype(x.dtype)

    # Batch tiling: pad B up to a multiple of TB with zero rows.
    TB = _pick_batch_tile(B, F)
    n_blocks = pl.cdiv(B, TB)
    B_pad = n_blocks * TB
    x_p = x if B_pad == B else jnp.pad(x, ((0, B_pad - B), (0, 0)))

    out = pl.pallas_call(
        _reward_net_kernel,
        out_shape=jax.ShapeDtypeStruct((B_pad, 1), x.dtype),
        grid_spec=pltpu.PrefetchScalarGridSpec(
            num_scalar_prefetch=0,
            grid=(n_blocks,),
            in_specs=[
                pl.BlockSpec((TB, F), lambda i: (i, 0)),   # x: streamed per tile
                pl.BlockSpec((F, HP), lambda i: (0, 0)),   # w1: resident
                pl.BlockSpec((1, HP), lambda i: (0, 0)),   # b1: resident
                pl.BlockSpec((1, HP), lambda i: (0, 0)),   # w2 row: resident
                pl.BlockSpec((1, 1), lambda i: (0, 0)),    # b2: resident
            ],
            out_specs=pl.BlockSpec((TB, 1), lambda i: (i, 0)),
        ),
        compiler_params=pltpu.CompilerParams(
            dimension_semantics=("parallel",),
        ),
    )(x_p, w1_p, b1_p, w2_row, b2_2d)

    return out[:B]


def init_params(key, feat_dim, hidden=10):
    # Deterministic synthetic init mimicking PyTorch's Linear default
    # (uniform in [-1/sqrt(fan_in), 1/sqrt(fan_in)]).
    k1, k2, k3, k4 = jax.random.split(key, 4)
    bound1 = 1.0 / jnp.sqrt(feat_dim)
    bound2 = 1.0 / jnp.sqrt(hidden)
    w1 = jax.random.uniform(k1, (feat_dim, hidden), jnp.float32, -bound1, bound1)
    b1 = jax.random.uniform(k2, (hidden,), jnp.float32, -bound1, bound1)
    w2 = jax.random.uniform(k3, (hidden, 1), jnp.float32, -bound2, bound2)
    b2 = jax.random.uniform(k4, (1,), jnp.float32, -bound2, bound2)
    return w1, b1, w2, b2


if __name__ == "__main__":
    key = jax.random.PRNGKey(0)
    kx, kp = jax.random.split(key)

    batch, feat_dim = 8, 32
    x = jax.random.normal(kx, (batch, feat_dim), jnp.float32)
    w1, b1, w2, b2 = init_params(kp, feat_dim)

    out = reward_net_forward(x, w1, b1, w2, b2)
    out = jax.block_until_ready(out)

    # Reference check in plain JAX (unpadded weights).
    ref = jnp.maximum(x @ w1 + b1, 0.0) @ w2 + b2
    assert out.shape == (batch, 1)
    assert jnp.allclose(out, ref, atol=1e-5, rtol=1e-5)

    print("KERNEL_OK")
</pallas_src>

<mosaic_0001>
module attributes {stable_mosaic.version = 11 : i64} {
  func.func @_reward_net_kernel(%arg0: i32, %arg1: memref<8x32xf32, #tpu.memory_space<vmem>>, %arg2: memref<32x128xf32, #tpu.memory_space<vmem>>, %arg3: memref<1x128xf32, #tpu.memory_space<vmem>>, %arg4: memref<1x128xf32, #tpu.memory_space<vmem>>, %arg5: memref<1x1xf32, #tpu.memory_space<vmem>>, %arg6: memref<8x1xf32, #tpu.memory_space<vmem>>) attributes {dimension_semantics = [#tpu.dimension_semantics<parallel>], iteration_bounds = array<i64: 1>, scalar_prefetch = 0 : i64, scratch_operands = 0 : i64, tpu.core_type = #tpu.core_type<tc>, window_params = [{transform_indices = @transform_0, window_bounds = array<i64: 8, 32>}, {pipeline_mode = #tpu.pipeline_mode<synchronous>, transform_indices = @transform_1, window_bounds = array<i64: 32, 128>}, {pipeline_mode = #tpu.pipeline_mode<synchronous>, transform_indices = @transform_2, window_bounds = array<i64: 1, 128>}, {pipeline_mode = #tpu.pipeline_mode<synchronous>, transform_indices = @transform_3, window_bounds = array<i64: 1, 128>}, {pipeline_mode = #tpu.pipeline_mode<synchronous>, transform_indices = @transform_4, window_bounds = array<i64: 1, 1>}, {transform_indices = @transform_5, window_bounds = array<i64: 8, 1>}]} {
    %c0 = arith.constant 0 : index
    %c0_0 = arith.constant 0 : index
    %0 = vector.load %arg1[%c0, %c0_0] : memref<8x32xf32, #tpu.memory_space<vmem>>, vector<8x32xf32>
    %c0_1 = arith.constant 0 : index
    %c0_2 = arith.constant 0 : index
    %1 = vector.load %arg2[%c0_1, %c0_2] : memref<32x128xf32, #tpu.memory_space<vmem>>, vector<32x128xf32>
    %cst = arith.constant dense<0.000000e+00> : vector<8x128xf32>
    %2 = tpu.matmul %0, %1, %cst {dimension_numbers = #tpu.dot_dimension_numbers<[1], [0], [0], [1], [0, 0, 1, 1], [], []>} : vector<8x32xf32>, vector<32x128xf32>, vector<8x128xf32> -> vector<8x128xf32>
    %c0_3 = arith.constant 0 : index
    %c0_4 = arith.constant 0 : index
    %3 = vector.load %arg3[%c0_3, %c0_4] : memref<1x128xf32, #tpu.memory_space<vmem>>, vector<1x128xf32>
    %4 = vector.broadcast %3 : vector<1x128xf32> to vector<8x128xf32>
    %5 = arith.addf %2, %4 : vector<8x128xf32>
    %cst_5 = arith.constant 0.000000e+00 : f32
    %6 = vector.broadcast %cst_5 : f32 to vector<8x128xf32>
    %7 = arith.maximumf %5, %6 : vector<8x128xf32>
    %c0_6 = arith.constant 0 : index
    %c0_7 = arith.constant 0 : index
    %8 = vector.load %arg4[%c0_6, %c0_7] : memref<1x128xf32, #tpu.memory_space<vmem>>, vector<1x128xf32>
    %9 = vector.broadcast %8 : vector<1x128xf32> to vector<8x128xf32>
    %10 = arith.mulf %7, %9 : vector<8x128xf32>
    %cst_8 = arith.constant dense<0.000000e+00> : vector<8xf32>
    %11 = vector.multi_reduction <add>, %10, %cst_8 [1] : vector<8x128xf32> to vector<8xf32>
    %12 = vector.shape_cast %11 : vector<8xf32> to vector<8x1xf32>
    %c0_9 = arith.constant 0 : index
    %c0_10 = arith.constant 0 : index
    %13 = vector.load %arg5[%c0_9, %c0_10] : memref<1x1xf32, #tpu.memory_space<vmem>>, vector<1x1xf32>
    %14 = vector.broadcast %13 : vector<1x1xf32> to vector<8x1xf32>
    %15 = arith.addf %12, %14 : vector<8x1xf32>
    %c0_11 = arith.constant 0 : index
    %c0_12 = arith.constant 0 : index
    %16 = vector.load %arg6[%c0_11, %c0_12] : memref<8x1xf32, #tpu.memory_space<vmem>>, vector<8x1xf32>
    tpu.vector_store %arg6[%c0_11, %c0_12], %15 {strides = array<i32>} : memref<8x1xf32, #tpu.memory_space<vmem>>, vector<8x1xf32>,
    return
  }
  func.func @transform_0(%arg0: i32) -> (i32, i32) {
    %c0_i32 = arith.constant 0 : i32
    %c0_i32_0 = arith.constant 0 : i32
    return %arg0, %c0_i32 : i32, i32
  }
  func.func @transform_1(%arg0: i32) -> (i32, i32) {
    %c0_i32 = arith.constant 0 : i32
    %c0_i32_0 = arith.constant 0 : i32
    %c0_i32_1 = arith.constant 0 : i32
    return %c0_i32, %c0_i32_0 : i32, i32
  }
  func.func @transform_2(%arg0: i32) -> (i32, i32) {
    %c0_i32 = arith.constant 0 : i32
    %c0_i32_0 = arith.constant 0 : i32
    %c0_i32_1 = arith.constant 0 : i32
    return %c0_i32, %c0_i32_0 : i32, i32
  }
  func.func @transform_3(%arg0: i32) -> (i32, i32) {
    %c0_i32 = arith.constant 0 : i32
    %c0_i32_0 = arith.constant 0 : i32
    %c0_i32_1 = arith.constant 0 : i32
    return %c0_i32, %c0_i32_0 : i32, i32
  }
  func.func @transform_4(%arg0: i32) -> (i32, i32) {
    %c0_i32 = arith.constant 0 : i32
    %c0_i32_0 = arith.constant 0 : i32
    %c0_i32_1 = arith.constant 0 : i32
    return %c0_i32, %c0_i32_0 : i32, i32
  }
  func.func @transform_5(%arg0: i32) -> (i32, i32) {
    %c0_i32 = arith.constant 0 : i32
    %c0_i32_0 = arith.constant 0 : i32
    return %arg0, %c0_i32 : i32, i32
  }
}

</mosaic_0001>

<bundles_post_ra>
// kernel: tpu_custom_call.1
= control target key start
LH: loop header
LB: loop body
LE: loop exit
PB: predicated region body
PF: predicated region fallthrough
CT: control target
= control target key end

     0   :  { %s322_s0 = inlined_call_operand.hbm [shape: f32[8,32], index: 0, kind: input, shape index: {}]   ;;  %s323_s1 = inlined_call_operand.hbm [shape: f32[32,128], index: 1, kind: input, shape index: {}]   ;;  %s324_s2 = inlined_call_operand.vmem [shape: f32[1,128], index: 2, kind: input, shape index: {}]   ;;  %s325_s3 = inlined_call_operand.vmem [shape: f32[1,128], index: 3, kind: input, shape index: {}]   ;;  %s326_s4 = inlined_call_operand.<no memory space> [shape: f32[1,1], index: 4, kind: input, shape index: {}]   ;;  %s327_s5 = inlined_call_operand.vmem [shape: f32[8,1], index: 5, kind: output, shape index: {}]  }
   0x1   :  { %v10_v0 = vstv %s326_s4 }
   0x2   :  { %11 = vst [vmem:[#allocation2] sm:$0x1] %v10_v0 }
   0x3   :  { %12 = vsyncpa [#allocation4], 0 }
   0x4   :  { %13 = vsyncpa [#allocation6], 0  ;;  %s242_s20 = smov [#allocation3]   ;;  %s243_s22 = smov [#allocation5]  }
   0x5   :  { %s20_s21 = sshll.u32 %s242_s20, 4  ;;  %s29_s23 = sshll.u32 %s243_s22, 4  ;;  %s21_s21 = int_to_ptr.vmem [resolvable:$true] %s20_s21  ;;  %s282_s23 = int_to_ptr.vmem [resolvable:$true] %s29_s23 }
   0x6   :  { %s194_s26 = scalar_lea.hbm %s322_s0, 128 }
   0x7   :  { %p195_p0 = scmp.ne.s32.totalorder %s322_s0, %s194_s26  ;;  %p198_p1 = scmp.lt.u32.totalorder %s194_s26, %s322_s0 }
   0x9   :  { %p200_p2 = pnand %p198_p1, %p195_p0 }
   0xb   :  { %203 = shalt.err (!%p200_p2)
}
   0xc   :  { %s204_s30 = scalar_lea.vmem %s21_s21, 128  ;;  %p209_p4 = scmp.lt.s32.totalorder %s21_s21, %s21_s21 }
   0xd   :  { %p205_p3 = scmp.ne.s32.totalorder %s21_s21, %s204_s30  ;;  %p210_p5 = scmp.lt.s32.totalorder %s204_s30, %s204_s30 }
   0xf   :  { %p211_p6 = por %p210_p5, %p209_p4 }
  0x11   :  { %p212_p7 = pnand %p211_p6, %p205_p3 }
  0x13   :  { %215 = shalt.err (!%p212_p7)
}
  0x14   :  { %23 = dma.hbm_to_vmem [thread:$0]  %s322_s0, 128, %s21_s21, [#allocation4]  }
  0x15   :  { %s216_s10 = scalar_lea.hbm %s323_s1, 512 }
  0x16   :  { %p217_p8 = scmp.ne.s32.totalorder %s323_s1, %s216_s10  ;;  %p220_p9 = scmp.lt.u32.totalorder %s216_s10, %s323_s1 }
  0x18   :  { %p222_p10 = pnand %p220_p9, %p217_p8 }
  0x1a   :  { %225 = shalt.err (!%p222_p10)
}
  0x1b   :  { %s226_s15 = scalar_lea.vmem %s282_s23, 512  ;;  %p231_p12 = scmp.lt.s32.totalorder %s282_s23, %s282_s23 }
  0x1c   :  { %p227_p11 = scmp.ne.s32.totalorder %s282_s23, %s226_s15  ;;  %p232_p13 = scmp.lt.s32.totalorder %s226_s15, %s226_s15 }
  0x1e   :  { %p233_p0 = por %p232_p13, %p231_p12 }
  0x20   :  { %p234_p1 = pnand %p233_p0, %p227_p11 }
  0x22   :  { %237 = shalt.err (!%p234_p1)
}
  0x23   :  { %s244_s0 = smov 128   ;;  %s245_s16 = smov 8  }
  0x24   :  { %35 = dma.hbm_to_vmem [thread:$0]  %s323_s1, 512, %s282_s23, [#allocation6], %s244_s0, %s244_s0, %s245_s16  }
  0x25   :  { %238 = dma.done.wait [#allocation4], 128  }
  0x26   :  { %239 = vsyncadd [#allocation4], 4294967168 }
  0x27   :  { %240 = dma.done.wait [#allocation6], 512  }
  0x28   :  { %241 = vsyncadd [#allocation6], 4294966784  ;;  %v246_v1 = vmov 0.0|0.0   ;;  %vm247_vm0 = vmmov 0   ;;  %v248_v2 = vmov 0.0   ;;  %v49_v3 = vld [vmem:[#allocation5] sm:$0xff] }
  0x29   :  { %181 = vmatprep.subr.bf16.mxu0 %v246_v1  ;;  %178 = vmatprep.mubr.msk.f32.mxu0 %vm247_vm0, %v248_v2  ;;  %v50_v4 = vld [vmem:[#allocation5 + $0x8] sm:$0xff]  ;;  %v51_v5 = vld [vmem:[#allocation5 + $0x10] sm:$0xff]  ;;  %v52_v7 = vld [vmem:[#allocation5 + $0x18] sm:$0xff]  ;;  %vm60_vm1 = vcmask 261120   ;;  %vm153_vm2 = vcmask 7168  }
  0x2a   :  { %v182_v6 = vpack.c.bf16 %v50_v4, %v49_v3  ;;  %v185_v8 = vpack.c.bf16 %v52_v7, %v51_v5  ;;  %v48_v9 = vld [vmem:[#allocation3] sm:$0xff]  ;;  %v161_v10 = vld [vmem:[%s324_s2] ss:$0 sm:$0xff] }
  0x2b   :  { %v163_v14 = vld [vmem:[%s325_s3] ss:$0 sm:$0xff] }
  0x2c   :  { %183 = vmatpush3.bf16.msra.mxu0 %v182_v6  ;;  %v164_v17 = vld [vmem:[#allocation2] ss:$0 sm:$0xff] }
  0x2d   :  { %184 = vmatprep.subr.bf16.mxu0 %v246_v1 }
  0x30   :  { %186 = vmatpush3.bf16.msra.mxu0 %v185_v8 }
  0x33   :  { %179 = vmatmul.mubr.msk.f32.vlgmr.msra.gmra.mrb[0].mxu0 %vm60_vm1, %v48_v9 }
 0x106   :  { %v130_v11 = vpop.f32.mrb[0].mxu0 }
 0x107   :  { %v131_v12 = vadd.f32 %v161_v10, %v130_v11  ;;  %v180_v13 = vpop.f32.mrb[1].mxu0 }
 0x109   :  { %v134_v15 = vmax.f32 %v131_v12, 0.0 }
 0x10b   :  { %v142_v16 = vmul.f32 %v163_v14, %v134_v15 }
 0x10d   :  { %143 = vadd.xlane.f32.xlu0 %v142_v16 }
 0x19a   :  { %v144_v18 = vpop.xlane.xlu0 %143 }
 0x19b   :  { %v152_v19 = vadd.f32 %v164_v17, %v144_v18 }
 0x19d   :  { %154 = vst.msk [vmem:[%s327_s5] sm:$0xff] %vm153_vm2, %v152_v19 }
 0x19e   :  { %159 = vsyncpa [#allocation4], 1 }
 0x19f   :  { %160 = vsyncpa [#allocation6], 1 }

</bundles_post_ra>
